<compile_context>
chip_gen: v5e
topology: v5e:2x2
jax: 0.10.0
libtpu: 0.0.40
codegen_flags: <defaults>
</compile_context>

<pallas_src>
import jax
import jax.numpy as jnp
from jax.experimental import pallas as pl
from jax.experimental.pallas import tpu as pltpu

_LANE = 128


def attn_mul_kernel(att_ref, c4_ref, out_ref):
    # att_ref : (1, Ca, T)  attention logits tile
    # c4_ref  : (1, Cc, T)  feature tile
    # out_ref : (1, Cc, T)
    att = att_ref[...].astype(jnp.float32)                  # stable softmax in f32
    m = jnp.max(att, axis=1, keepdims=True)                 # (1, 1, T)  cross-sublane max (XLU)
    e = jnp.exp(att - m)                                     # (1, Ca, T) EUP
    denom = jnp.sum(e, axis=1, keepdims=True)                # (1, 1, T)
    # Softmax over the channel axis, keep channel 0 -> broadcast weight.
    # Exact division (approx reciprocal was not accurate enough vs the reference).
    w = e[:, 0:1, :] / denom                                  # (1, 1, T) f32
    out = w * c4_ref[...].astype(jnp.float32)                 # multiply in f32 (HBM-bound: free)
    out_ref[...] = out.astype(out_ref.dtype)


def _round_up(x, m):
    return (x + m - 1) // m * m


def _pick_tile_hw(HW, N, target):
    if HW <= _LANE:
        return HW                       # full dim: exempt from the 128-divisibility rule
    # Lane-dense (multiple of 128) tile, <= HW; the final block may be ragged.
    tile = min(target, (HW // _LANE) * _LANE)
    if N == 1:
        # v7x has 2 TensorCores: keep at least 2 grid steps along HW when N == 1.
        tile = min(tile, _round_up(pl.cdiv(HW, 2), _LANE))
    return max(tile, _LANE)


def attention_multiply(attention_layer, c4, *, max_tile_hw=32768):
    """attention_layer: (N, Ca, H, W); c4: (N, Cc, H, W) -> (N, Cc, H, W)."""
    N, Ca, H, W = attention_layer.shape
    Nc, Cc, Hc, Wc = c4.shape
    assert (N, H, W) == (Nc, Hc, Wc), "batch/spatial dims must match"
    HW = H * W

    att = attention_layer.reshape(N, Ca, HW)
    c4f = c4.reshape(N, Cc, HW)

    att_isz = jnp.dtype(attention_layer.dtype).itemsize
    c4_isz = jnp.dtype(c4.dtype).itemsize
    out_isz = c4_isz

    # ---- generation-aware VMEM budget (v7x: 64 MiB/TC, v5e/v6e: 128 MiB) ----
    try:
        vmem_cap = int(pltpu.get_tpu_info().vmem_capacity_bytes)
    except Exception:
        vmem_cap = 64 << 20  # conservative fallback (v7x per-TC)

    # Double-buffered bytes per lane column: att block + c4 block + out block.
    per_lane_db = 2 * (Ca * att_isz + Cc * c4_isz + Cc * out_isz)
    budget_db = min(vmem_cap // 2, 48 << 20)
    fit_tile = max(_LANE, (budget_db // per_lane_db) // _LANE * _LANE)
    target = min(max_tile_hw, fit_tile)

    tile_hw = _pick_tile_hw(HW, N, target)
    # No wrapper padding: ragged final block -> OOB lanes compute garbage (per-lane
    # independent) and OOB stores are dropped.
    num_hw_tiles = pl.cdiv(HW, tile_hw)

    db_block_bytes = per_lane_db * tile_hw
    vmem_limit = int(min(vmem_cap * 7 // 8, max(32 << 20, db_block_bytes + (8 << 20))))

    out = pl.pallas_call(
        attn_mul_kernel,
        out_shape=jax.ShapeDtypeStruct((N, Cc, HW), c4.dtype),
        grid_spec=pltpu.PrefetchScalarGridSpec(
            num_scalar_prefetch=0,
            grid=(N, num_hw_tiles),
            in_specs=[
                pl.BlockSpec((1, Ca, tile_hw), lambda n, h: (n, 0, h)),
                pl.BlockSpec((1, Cc, tile_hw), lambda n, h: (n, 0, h)),
            ],
            out_specs=pl.BlockSpec((1, Cc, tile_hw), lambda n, h: (n, 0, h)),
        ),
        compiler_params=pltpu.CompilerParams(
            # Both axes independent: shards across v7x's 2 TensorCores even at small N.
            dimension_semantics=("parallel", "parallel"),
            vmem_limit_bytes=vmem_limit,
        ),
    )(att, c4f)

    return out.reshape(N, Cc, H, W)


def attention_multiply_ref(attention_layer, c4):
    # Pure-JAX reference mirroring the PyTorch forward.
    sm = jax.nn.softmax(attention_layer.astype(jnp.float32), axis=1)
    w = sm[:, 0:1, :, :]                 # out[:, 0, :, :] then unsqueeze(1)
    return (w * c4.astype(jnp.float32)).astype(c4.dtype)


if __name__ == "__main__":
    key = jax.random.PRNGKey(0)

    # Case 1: 128-multiple spatial extent (single full tile per batch).
    k1, k2, k3, k4 = jax.random.split(key, 4)
    N, Ca, Cc, H, W = 2, 4, 8, 16, 16
    att1 = jax.random.normal(k1, (N, Ca, H, W), dtype=jnp.float32)
    c41 = jax.random.normal(k2, (N, Cc, H, W), dtype=jnp.float32)
    out1 = jax.block_until_ready(attention_multiply(att1, c41))
    ref1 = attention_multiply_ref(att1, c41)
    assert out1.shape == (N, Cc, H, W)
    assert jnp.allclose(out1, ref1, atol=2e-3, rtol=2e-3), "mismatch vs reference (case 1)"

    # Case 2: non-128-multiple spatial extent (exercises the ragged final block path).
    H2 = W2 = 14
    att2 = jax.random.normal(k3, (N, Ca, H2, W2), dtype=jnp.float32)
    c42 = jax.random.normal(k4, (N, Cc, H2, W2), dtype=jnp.float32)
    out2 = jax.block_until_ready(attention_multiply(att2, c42))
    ref2 = attention_multiply_ref(att2, c42)
    assert out2.shape == (N, Cc, H2, W2)
    assert jnp.allclose(out2, ref2, atol=2e-3, rtol=2e-3), "mismatch vs reference (case 2)"

    print("KERNEL_OK")
</pallas_src>

<mosaic_0001>
module attributes {stable_mosaic.version = 11 : i64} {
  func.func @attn_mul_kernel(%arg0: i32, %arg1: i32, %arg2: memref<1x4x256xf32, #tpu.memory_space<vmem>>, %arg3: memref<1x8x256xf32, #tpu.memory_space<vmem>>, %arg4: memref<1x8x256xf32, #tpu.memory_space<vmem>>) attributes {dimension_semantics = [#tpu.dimension_semantics<parallel>, #tpu.dimension_semantics<parallel>], iteration_bounds = array<i64: 2, 1>, scalar_prefetch = 0 : i64, scratch_operands = 0 : i64, tpu.core_type = #tpu.core_type<tc>, window_params = [{transform_indices = @transform_0, window_bounds = array<i64: 1, 4, 256>}, {transform_indices = @transform_1, window_bounds = array<i64: 1, 8, 256>}, {transform_indices = @transform_2, window_bounds = array<i64: 1, 8, 256>}]} {
    %c0 = arith.constant 0 : index
    %c0_0 = arith.constant 0 : index
    %c0_1 = arith.constant 0 : index
    %0 = vector.load %arg2[%c0, %c0_0, %c0_1] : memref<1x4x256xf32, #tpu.memory_space<vmem>>, vector<1x4x256xf32>
    %cst = arith.constant dense<0xFF800000> : vector<1x256xf32>
    %1 = vector.multi_reduction <maximumf>, %0, %cst [1] : vector<1x4x256xf32> to vector<1x256xf32>
    %2 = vector.shape_cast %1 : vector<1x256xf32> to vector<1x1x256xf32>
    %3 = vector.broadcast %2 : vector<1x1x256xf32> to vector<1x4x256xf32>
    %4 = arith.subf %0, %3 : vector<1x4x256xf32>
    %5 = math.exp %4 : vector<1x4x256xf32>
    %cst_2 = arith.constant dense<0.000000e+00> : vector<1x256xf32>
    %6 = vector.multi_reduction <add>, %5, %cst_2 [1] : vector<1x4x256xf32> to vector<1x256xf32>
    %7 = vector.shape_cast %6 : vector<1x256xf32> to vector<1x1x256xf32>
    %8 = vector.extract_strided_slice %5 {offsets = [0, 0, 0], sizes = [1, 1, 256], strides = [1, 1, 1]} : vector<1x4x256xf32> to vector<1x1x256xf32>
    %9 = arith.divf %8, %7 : vector<1x1x256xf32>
    %c0_3 = arith.constant 0 : index
    %c0_4 = arith.constant 0 : index
    %c0_5 = arith.constant 0 : index
    %10 = vector.load %arg3[%c0_3, %c0_4, %c0_5] : memref<1x8x256xf32, #tpu.memory_space<vmem>>, vector<1x8x256xf32>
    %11 = vector.broadcast %9 : vector<1x1x256xf32> to vector<1x8x256xf32>
    %12 = arith.mulf %11, %10 : vector<1x8x256xf32>
    %c0_6 = arith.constant 0 : index
    %c0_7 = arith.constant 0 : index
    %c0_8 = arith.constant 0 : index
    %13 = vector.load %arg4[%c0_6, %c0_7, %c0_8] : memref<1x8x256xf32, #tpu.memory_space<vmem>>, vector<1x8x256xf32>
    tpu.vector_store %arg4[%c0_6, %c0_7, %c0_8], %12 {strides = array<i32>} : memref<1x8x256xf32, #tpu.memory_space<vmem>>, vector<1x8x256xf32>,
    return
  }
  func.func @transform_0(%arg0: i32, %arg1: i32) -> (i32, i32, i32) {
    %c0_i32 = arith.constant 0 : i32
    %c0_i32_0 = arith.constant 0 : i32
    return %arg0, %c0_i32, %arg1 : i32, i32, i32
  }
  func.func @transform_1(%arg0: i32, %arg1: i32) -> (i32, i32, i32) {
    %c0_i32 = arith.constant 0 : i32
    %c0_i32_0 = arith.constant 0 : i32
    return %arg0, %c0_i32, %arg1 : i32, i32, i32
  }
  func.func @transform_2(%arg0: i32, %arg1: i32) -> (i32, i32, i32) {
    %c0_i32 = arith.constant 0 : i32
    %c0_i32_0 = arith.constant 0 : i32
    return %arg0, %c0_i32, %arg1 : i32, i32, i32
  }
}

</mosaic_0001>

<bundles_post_ra>
// kernel: tpu_custom_call.1
= control target key start
LH: loop header
LB: loop body
LE: loop exit
PB: predicated region body
PF: predicated region fallthrough
CT: control target
= control target key end

     0   :  { %7 = vsyncpa [#allocation3], 0  ;;  %s847_s0 = inlined_call_operand.hbm [shape: f32[2,4,256], index: 0, kind: input, shape index: {}]   ;;  %s848_s1 = inlined_call_operand.hbm [shape: f32[2,8,256], index: 1, kind: input, shape index: {}]   ;;  %s849_s2 = inlined_call_operand.hbm [shape: f32[2,8,256], index: 2, kind: output, shape index: {}]  }
   0x1   :  { %9 = vsyncpa [#allocation3 + $0x1], 0 }
   0x2   :  { %10 = vsyncpa [#allocation6], 0 }
   0x3   :  { %12 = vsyncpa [#allocation6 + $0x1], 0 }
   0x4   :  { %13 = vsyncpa [#allocation4], 0 }
   0x5   :  { %15 = vsyncpa [#allocation4 + $0x1], 0  ;;  %s695_s9 = smov 0   ;;  %s697_s10 = smov 0  }
   0x6   :  { %s699_s11 = smov 0   ;;  %s701_s12 = smov 0  }
   0x7   :  { %s703_s13 = smov 0   ;;  %s705_s14 = smov 0  }
   0x8 LB: > { %s439_s15 = sadd.s32 4294967295, %s678_s14   ;;  %s440_s16 = sadd.s32 4294967294, %s678_s14   ;;  %s678_s14 = sphi %s705_s14, %s21_s14   ;;  %s674_s13 = sphi %s703_s13, %s859_s13   ;;  %s670_s12 = sphi %s701_s12, %s858_s12   ;;  %s666_s11 = sphi %s699_s11, %s857_s11   ;;  %s662_s10 = sphi %s697_s10, %s856_s10   ;;  %s658_s9 = sphi %s695_s9, %s855_s9  }
   0x9   : > { %s33_s17 = sadd.s32 1, %s674_s13  ;;  %s42_s18 = sadd.s32 1, %s666_s11 }
   0xa   : > { %p35_p0 = scmp.ge.s32.totalorder %s33_s17, 2  ;;  %p49_p1 = scmp.ne.s32.totalorder %s666_s11, %s662_s10 }
   0xb   : > { %p50_p2 = scmp.eq.s32.totalorder %s678_s14, 0  ;;  %p55_p3 = scmp.ne.s32.totalorder %s662_s10, %s658_s9 }
   0xc   : > { %s861_s17 = smov (%p35_p0, %s33_s17), 0  ;;  %p56_p5 = scmp.eq.s32.totalorder %s439_s15, 0 }
   0xd   : > { %p736_p4 = por %p50_p2, %p49_p1  ;;  %s37_s20 = ssub.s32 %s674_s13, %s861_s17 }
   0xe   : > { %p109_p6 = scmp.eq.s32.totalorder %s439_s15, 1  ;;  %p40_p7 = scmp.eq.s32.totalorder %s37_s20, 0 }
   0xf   : > { %p742_p8 = por %p56_p5, %p55_p3  ;;  %p115_p10 = scmp.eq.s32.totalorder %s440_s16, 1 }
  0x10   : > { %p746_p9 = por %p109_p6, %p49_p1  ;;  %p442_p12 = scmp.ge.s32.totalorder %s678_s14, 2 }
  0x11   : > { %s751_s23 = scalar_select %p40_p7, %s666_s11, %s42_s18  }
  0x12   : > { %p753_p11 = por %p115_p10, %p55_p3  ;;  %p478_p13 = scmp.lt.s32.totalorder %s678_s14, 2 }
  0x13   : > { %s135_s25 = sand.u32 1, %s666_s11   ;;  %s458_s27 = sshll.u32 %s674_s13, 3 }
  0x14   : > { %s443_s26 = sshll.u32 %s135_s25, 3  ;;  %s146_s30 = scalar_lea.hbm %s847_s0, %s458_s27 }
  0x15   : > { %s139_s3 = scalar_lea.vmem [#allocation2], %s443_s26  ;;  %s148_s5 = sshll.u32 %s146_s30, 4  ;;  %s149_s5 = int_to_ptr.hbm [resolvable:$true] %s148_s5 }
  0x16   : > { %s150_s4 = sshll.u32 %s139_s3, 4  ;;  %p766_p0 = pnand %p478_p13, %p736_p4  ;;  %s151_s4 = int_to_ptr.vmem [resolvable:$true] %s150_s4 }
  0x17   : > { %p449_p1 = scmp.ge.s32.totalorder %s678_s14, 1  ;;  %p177_p2 = scmp.lt.s32.totalorder %s678_s14, 3 }
  0x18   : > { %s136_s7 = scalar_lea.sflag [#allocation3], %s135_s25  ;;  %s446_s8 = sshll.u32 %s135_s25, 4 }
  0x19   : > { %470 = dma.hbm_to_vmem [thread:$0]  (!%p766_p0), %s149_s5, 128, %s151_s4, %s136_s7  }
  0x1a   : > { %p178_p3 = pnand %p449_p1, %p177_p2  ;;  %s459_s15 = sshll.u32 %s674_s13, 4 }
  0x1b   : > { %s168_s20 = scalar_lea.hbm %s848_s1, %s459_s15  ;;  %s161_s26 = scalar_lea.vmem [#allocation5], %s446_s8 }
  0x1c   : > { %s172_s19 = sshll.u32 %s161_s26, 4  ;;  %s170_s27 = sshll.u32 %s168_s20, 4  ;;  %s173_s19 = int_to_ptr.vmem [resolvable:$true] %s172_s19  ;;  %s171_s27 = int_to_ptr.hbm [resolvable:$true] %s170_s27 }
  0x1d   : > { %s158_s28 = scalar_lea.sflag [#allocation6], %s135_s25  ;;  %181 = sbr.rel (%p178_p3) target bundleno = 127 (0x7f), region = 28 }
  0x1e   : > { %473 = dma.hbm_to_vmem [thread:$0]  (!%p766_p0), %s171_s27, 256, %s173_s19, %s158_s28  }
  0x1f   : > { %s781_s29 = sand.u32 (!%p178_p3), 1, %s662_s10  }
  0x20   : > { %s450_s30 = sshll.u32 (!%p178_p3), %s781_s29, 3  ;;  %s184_s3 = scalar_lea.sflag (!%p178_p3), [#allocation3], %s781_s29 }
  0x21   : > { %s187_s4 = scalar_lea.vmem (!%p178_p3), [#allocation2], %s450_s30 }
  0x22   : > { %645 = dma.done.wait (%p742_p8), %s184_s3, 128  }
  0x23   : > { %647 = vsyncadd (%p742_p8), %s184_s3, 4294967168  ;;  %s451_s25 = sshll.u32 %s781_s29, 4  ;;  %s194_s5 = scalar_lea.sflag [#allocation6], %s781_s29 }
  0x24   : > { %s793_s6 = scalar_lea.vmem [#allocation5], %s451_s25 }
  0x25   : > { %649 = dma.done.wait (%p742_p8), %s194_s5, 256  }
  0x26   : > { %651 = vsyncadd (%p742_p8), %s194_s5, 4294967040  ;;  %v227_v0 = vld [vmem:[%s187_s4] sm:$0xff]  ;;  %vm234_vm0 = vcmask 1043456   ;;  %s460_s21 = sshll.u32 %s670_s12, 4  ;;  %v297_v53 = vld [vmem:[%s793_s6] sm:$0xff]  ;;  %s223_s16 = scalar_lea.vmem [#allocation7], %s451_s25 }
  0x27   : > { %229 = vst [vmem:[#allocation1] ss:$2 sm:$0xff] %v227_v0  ;;  %s324_s15 = scalar_lea.hbm %s849_s2, %s460_s21  ;;  %v298_v54 = vld [vmem:[%s793_s6 + $0x8] sm:$0xff]  ;;  %s326_s18 = sshll.u32 %s223_s16, 4  ;;  %s327_s18 = int_to_ptr.vmem [resolvable:$true] %s326_s18 }
  0x28   : > { %s328_s20 = sshll.u32 %s324_s15, 4  ;;  %s311_s12 = scalar_lea.sflag [#allocation4], %s781_s29  ;;  %s329_s20 = int_to_ptr.hbm [resolvable:$true] %s328_s20 }
  0x29   : > { %s606_s26 = sshra.s32 %s329_s20, 4  ;;  %s612_s30 = scalar_lea.hbm %s849_s2, 32  ;;  %s607_s26 = int_to_ptr.hbm [resolvable:$true] %s606_s26 }
  0x2a   : > { %s608_s19 = scalar_lea.hbm %s607_s26, 16  ;;  %p613_p7 = scmp.lt.s32.totalorder %s607_s26, %s849_s2 }
  0x2b   : > { %p609_p4 = scmp.ne.s32.totalorder %s607_s26, %s608_s19  ;;  %p614_p8 = scmp.lt.s32.totalorder %s612_s30, %s608_s19 }
  0x2d   : > { %p610_p5 = pnand %p609_p4, %p746_p9  ;;  %p615_p10 = por %p614_p8, %p613_p7 }
  0x2e   : > { %v230_v1 = vld.sshfl [vmem:[#allocation1] sm:$0xff pattern:$0x75316420]  ;;  %v231_v2 = vld.sshfl [vmem:[#allocation1 + $0x8] sm:$0xff pattern:$0x75316420] }
  0x2f   : > { %v235_v3 = vsel %vm234_vm0, %v230_v1, -inf  ;;  %v242_v4 = vsel %vm234_vm0, %v231_v2, -inf  ;;  %p611_p6 = pneg %p610_p5 }
  0x30   : > { %v236_v5 = vrot.slane %v235_v3, 4  ;;  %v243_v6 = vrot.slane %v242_v4, 4 }
  0x31   : > { %p616_p13 = pnand %p615_p10, %p611_p6 }
  0x32   : > { %v237_v7 = vmax.f32 %v235_v3, %v236_v5  ;;  %v244_v8 = vmax.f32 %v242_v4, %v243_v6 }
  0x34   : > { %v238_v9 = vrot.slane %v237_v7, 2  ;;  %v245_v10 = vrot.slane %v244_v8, 2 }
  0x36   : > { %v239_v11 = vmax.f32 %v237_v7, %v238_v9  ;;  %v246_v12 = vmax.f32 %v244_v8, %v245_v10 }
  0x38   : > { %v240_v13 = vrot.slane %v239_v11, 1  ;;  %v247_v14 = vrot.slane %v246_v12, 1 }
  0x3a   : > { %v248_v15 = vmax.f32 %v246_v12, %v247_v14  ;;  %v241_v16 = vmax.f32 %v239_v11, %v240_v13 }
  0x3c   : > { %v251_v17 = vrot.slane %v248_v15, 4 }
  0x3e   : > { %v252_v18 = vsel %vm234_vm0, %v241_v16, %v251_v17 }
  0x3f   : > { %v254_v19 = vsub.f32 %v227_v0, %v252_v18 }
  0x41   : > { %v255_v20 = vmul.f32 1.442695, %v254_v19 }
  0x43   : > { %528 = vpow2.f32 %v255_v20 }
  0x49   : > { %v529_v21 = vpop.eup %528 }
  0x4a   : > { %258 = vst [vmem:[#allocation1] ss:$2 sm:$0xff] %v529_v21 }
  0x51   : > { %v259_v22 = vld.sshfl [vmem:[#allocation1] sm:$0xff pattern:$0x75316420]  ;;  %v260_v23 = vld.sshfl [vmem:[#allocation1 + $0x8] sm:$0xff pattern:$0x75316420] }
  0x52   : > { %v263_v24 = vsel %vm234_vm0, %v259_v22, 0.0  ;;  %v270_v25 = vsel %vm234_vm0, %v260_v23, 0.0 }
  0x53   : > { %v264_v26 = vrot.slane %v263_v24, 4  ;;  %v271_v27 = vrot.slane %v270_v25, 4 }
  0x55   : > { %v265_v28 = vadd.f32 %v264_v26, %v263_v24  ;;  %v272_v29 = vadd.f32 %v271_v27, %v270_v25 }
  0x57   : > { %v266_v30 = vrot.slane %v265_v28, 2  ;;  %v273_v31 = vrot.slane %v272_v29, 2 }
  0x59   : > { %v267_v32 = vadd.f32 %v266_v30, %v265_v28  ;;  %v274_v33 = vadd.f32 %v273_v31, %v272_v29 }
  0x5b   : > { %v268_v34 = vrot.slane %v267_v32, 1  ;;  %v275_v35 = vrot.slane %v274_v33, 1 }
  0x5d   : > { %v276_v36 = vadd.f32 %v275_v35, %v274_v33  ;;  %v269_v37 = vadd.f32 %v268_v34, %v267_v32 }
  0x5f   : > { %v279_v38 = vrot.slane %v276_v36, 4 }
  0x61   : > { %v280_v39 = vsel %vm234_vm0, %v269_v37, %v279_v38 }
  0x62   : > { %530 = vrcp.f32 %v280_v39  ;;  %v293_v43 = vand.u32 2147483648, %v280_v39  ;;  %v291_v45 = vand.u32 2147483647, %v280_v39  ;;  %vm287_vm2 = vweird.f32 %v280_v39 }
  0x64   : > { %v294_v47 = vor.u32 1.1754944e-38, %v293_v43  ;;  %vm292_vm4 = vcmp.eq.f32.partialorder %v291_v45, 8.507059e+37 }
  0x68   : > { %v531_v40 = vpop.eup %530 }
  0x69   : > { %v283_v41 = vmul.f32 %v531_v40, %v280_v39  ;;  %vm288_vm1 = vweird.f32 %v531_v40 }
  0x6a   : > { %vm289_vm3 = vmor %vm287_vm2, %vm288_vm1 }
  0x6b   : > { %v284_v42 = vsub.f32 1.0, %v283_v41 }
  0x6d   : > { %v285_v44 = vmul.f32 %v531_v40, %v284_v42 }
  0x6f   : > { %v286_v46 = vadd.f32 %v531_v40, %v285_v44 }
  0x71   : > { %v290_v48 = vsel %vm289_vm3, %v531_v40, %v286_v46 }
  0x72   : > { %v295_v49 = vsel %vm292_vm4, %v294_v47, %v290_v48 }
  0x73   : > { %v296_v50 = vmul.f32 %v529_v21, %v295_v49 }
  0x75   : > { %v300_v51 = vperm.slane %v296_v50, 0  ;;  %v301_v52 = vperm.slane %v296_v50, 4 }
  0x77   : > { %v304_v55 = vperm.slane %v300_v51, 0  ;;  %v305_v56 = vperm.slane %v301_v52, 0 }
  0x79   : > { %v306_v57 = vmul.f32 %v304_v55, %v297_v53  ;;  %v307_v58 = vmul.f32 %v305_v56, %v298_v54 }
  0x7b   : > { %308 = vst [vmem:[%s223_s16] sm:$0xff] %v306_v57 }
  0x7c   : > { %309 = vst [vmem:[%s223_s16 + $0x8] sm:$0xff] %v307_v58 }
  0x7d   : > { %619 = shalt.err (!%p616_p13)
}
  0x7e   : > { %465 = dma.vmem_to_hbm [thread:$0]  (%p746_p9), %s327_s18, 256, %s329_s20, %s311_s12  }
  0x7f PF: > { %s340_s29 = sand.u32 1, %s658_s9   ;;  %p475_p0 = pnand %p442_p12, %p753_p11 }
  0x80   : > { %s341_s25 = scalar_lea.sflag [#allocation4], %s340_s29 }
  0x81   : > { %p476_p1 = pneg %p475_p0 }
  0x83   : > { %653 = dma.done.wait (%p476_p1), %s341_s25, 256  }
  0x84   : > { %655 = vsyncadd (%p476_p1), %s341_s25, 4294967040  ;;  %s21_s14 = sadd.s32 1, %s678_s14   ;;  %s855_s9 = smov %s662_s10 }
  0x85   : > { %p18_p2 = scmp.ge.s32.totalorder %s21_s14, 4   ;;  %s856_s10 = smov %s666_s11 }
  0x86   : > { %s857_s11 = smov %s751_s23  ;;  %s858_s12 = smov %s674_s13 }
  0x87   : > { %s859_s13 = smov %s861_s17  ;;  %20 = sbr.rel (!%p18_p2) target bundleno = 8 (0x8), region = 86 }
  0x8c   :  { %347 = vsyncpa [#allocation3], 1 }
  0x8d   :  { %349 = vsyncpa [#allocation3 + $0x1], 1 }
  0x8e   :  { %350 = vsyncpa [#allocation6], 1 }
  0x8f   :  { %352 = vsyncpa [#allocation6 + $0x1], 1 }
  0x90   :  { %353 = vsyncpa [#allocation4], 1 }
  0x91   :  { %355 = vsyncpa [#allocation4 + $0x1], 1 }

</bundles_post_ra>
